<compile_context>
chip_gen: v5e
topology: v5e:2x2
jax: 0.10.0
libtpu: 0.0.40
codegen_flags: <defaults>
</compile_context>

<pallas_src>
import jax
import jax.numpy as jnp
from jax.experimental import pallas as pl
from jax.experimental.pallas import tpu as pltpu


def _pick_batch_block(n, h, target_rows=256):
    """Largest divisor of n with bb*h <= target_rows, keeping >= 2 grid steps."""
    best = 1
    for d in range(1, n + 1):
        if n % d != 0 or d * h > target_rows:
            continue
        if n >= 2 and n // d < 2:
            continue   # keep >= 2 parallel steps so v7x's two TensorCores both work
        best = d
    return best


def _pack_conv_weight(w_hwio, Wdim):
    """(3,3,Cin,Cout) HWIO -> (Wdim*Cin, 3*Wdim*Cout) banded weight.

    Column slabs ordered [ky=0 | ky=1 | ky=2] (dy = -1, 0, +1).  Within a slab
    M[ws*Cin+ci, wd*Cout+co] = w[ky, ws-wd+1, ci, co] for |ws-wd| <= 1 else 0,
    implementing the kx taps and the W-axis zero padding of a SAME conv as a
    single matmul.
    """
    _, _, Cin, Cout = w_hwio.shape
    ws = jnp.arange(Wdim)[:, None]                 # source column
    wd = jnp.arange(Wdim)[None, :]                 # destination column
    kx = ws - wd + 1                               # tap index mapping src -> dst
    valid = ((kx >= 0) & (kx <= 2)).astype(w_hwio.dtype)[..., None, None]
    kx_safe = jnp.clip(kx, 0, 2)
    mats = []
    for ky in range(3):
        t = w_hwio[ky][kx_safe] * valid            # (Wdim, Wdim, Cin, Cout)
        mats.append(t.transpose(0, 2, 1, 3).reshape(Wdim * Cin, Wdim * Cout))
    return jnp.concatenate(mats, axis=1)           # (Wdim*Cin, 3*Wdim*Cout)


def make_convblock_kernel(bb, WC, eps, mxu_dtype, use_emat):
    """Fused kernel for one block of bb images (rows = bb*H, lanes = W*Cout)."""

    def kernel(x_ref, m1_ref, m2_ref, aff_ref, sd2_ref, srow_ref,
               rmat_ref, bmat_ref, *rest):
        if use_emat:
            emat_ref, o_ref = rest
        else:
            (o_ref,) = rest

        aff = aff_ref[...]        # (6, WC) f32 rows: [b1, g1, be1, b2, g2, be2]
        sd2 = sd2_ref[...]        # (M, 2M)  merged [shift-down | shift-up], block-diag
        srow = srow_ref[...]      # (2bb, 2M) per-image row-sum matrix
        rmat = rmat_ref[...]      # (WC, Gp) lane -> group reduce (1/cnt folded in)
        bmat = bmat_ref[...]      # (Gp, WC) group -> lane broadcast

        def conv(x_mxu, m_ref, bias_row):
            # One bf16 MXU matmul does every kx tap of all three ky slabs.
            q = jnp.dot(x_mxu, m_ref[...], preferred_element_type=jnp.float32)
            # ky=0 / ky=2 slabs need a (per-image, zero-padded) row shift:
            # one merged (M, 2M) matmul on the sublane-stacked slabs.
            qs = jnp.concatenate([q[:, :WC], q[:, 2 * WC:]], axis=0)        # (2M, WC)
            shifted = jnp.dot(sd2, qs, preferred_element_type=jnp.float32)  # (M, WC)
            return q[:, WC:2 * WC] + shifted + bias_row

        def gn_silu(y, gamma_row, beta_row):
            # Per-image sums of y and y*y in one MXU launch (stacked operand).
            # All GN statistics stay f32 (bf16 is confined to the conv operands).
            ys = jnp.concatenate([y, y * y], axis=0)                        # (2M, WC)
            t = jnp.dot(srow, ys, preferred_element_type=jnp.float32)       # (2bb, WC)
            u = jnp.dot(t, rmat, preferred_element_type=jnp.float32)        # (2bb, Gp)
            mean, ex2 = u[:bb], u[bb:]
            var = jnp.maximum(ex2 - mean * mean, 0.0)     # one-pass var, clamp >= 0
            inv = jax.lax.rsqrt(var + eps)
            coef = jnp.concatenate([inv, -mean * inv], axis=0)              # (2bb, Gp)
            coefl = jnp.dot(coef, bmat, preferred_element_type=jnp.float32) # (2bb, WC)
            scale_row = coefl[:bb] * gamma_row                              # (bb, WC)
            shift_row = coefl[bb:] * gamma_row + beta_row                   # (bb, WC)
            if use_emat:   # bb > 1: broadcast per-image rows back to all M rows
                pair = jnp.concatenate([scale_row, shift_row], axis=1)      # (bb, 2WC)
                rows = jnp.dot(emat_ref[...], pair,
                               preferred_element_type=jnp.float32)          # (M, 2WC)
                yn = y * rows[:, :WC] + rows[:, WC:]
            else:          # bb == 1: plain lane broadcasting
                yn = y * scale_row + shift_row
            return yn * jax.nn.sigmoid(yn)                # SiLU

        x = x_ref[...]                                    # (M, W*Cin), mxu_dtype
        y1 = gn_silu(conv(x, m1_ref, aff[0:1]), aff[1:2], aff[2:3])
        y2 = gn_silu(conv(y1.astype(mxu_dtype), m2_ref, aff[3:4]),
                     aff[4:5], aff[5:6])
        o_ref[...] = y2.astype(o_ref.dtype)               # lane-dense (M, W*Cout)

    return kernel


def conv_block(x, params, *, groups, eps=1e-5, mxu_dtype=jnp.bfloat16,
               batch_block=None):
    """x: (N, H, W, Cin) f32 NHWC -> (N, H, W, Cout) f32 NHWC."""
    N, H, W, Cin = x.shape
    w1, b1, g1, be1, w2, b2, g2, be2 = params
    Cout = w1.shape[-1]
    assert Cout % groups == 0, "GroupNorm requires Cout % groups == 0"
    Cpg = Cout // groups
    WCi, WC = W * Cin, W * Cout
    bb = batch_block if batch_block is not None else _pick_batch_block(N, H)
    assert N % bb == 0
    M = bb * H
    Gp = max(groups, 128)                  # pad groups up to a full 128-lane width
    cnt = float(H * W * Cpg)               # elements per GroupNorm group per image

    # ---- host-precomputed constants (hoisted out of the kernel) -------------
    x_p = x.reshape(N * H, WCi).astype(mxu_dtype)        # lane = w*Cin + ci
    m1 = _pack_conv_weight(w1, W).astype(mxu_dtype)      # (W*Cin,  3*W*Cout)
    m2 = _pack_conv_weight(w2, W).astype(mxu_dtype)      # (W*Cout, 3*W*Cout)
    aff = jnp.stack([jnp.tile(v, W) for v in (b1, g1, be1, b2, g2, be2)]
                    ).astype(jnp.float32)                # (6, WC)
    lane_group = (jnp.arange(WC) % Cout) // Cpg          # group id per packed lane
    rmat = (lane_group[:, None] == jnp.arange(Gp)[None, :]
            ).astype(jnp.float32) / cnt                  # (WC, Gp), 1/cnt folded in
    bmat = (jnp.arange(Gp)[:, None] == lane_group[None, :]
            ).astype(jnp.float32)                        # (Gp, WC)
    eye_bb = jnp.eye(bb, dtype=jnp.float32)
    sd = jnp.kron(eye_bb, jnp.eye(H, k=-1, dtype=jnp.float32))  # row h <- h-1
    su = jnp.kron(eye_bb, jnp.eye(H, k=+1, dtype=jnp.float32))  # row h <- h+1
    sd2 = jnp.concatenate([sd, su], axis=1)                     # (M, 2M)
    srow = jnp.kron(jnp.eye(2, dtype=jnp.float32),
                    jnp.kron(eye_bb, jnp.ones((1, H), jnp.float32)))  # (2bb, 2M)
    use_emat = bb > 1
    emat = jnp.kron(eye_bb, jnp.ones((H, 1), jnp.float32)) if use_emat else None

    kernel = make_convblock_kernel(bb, WC, eps, mxu_dtype, use_emat)

    def const_spec(shape):
        # Full-array block, same block every grid step.
        return pl.BlockSpec(shape, lambda n, _r=len(shape): (0,) * _r)

    in_specs = [
        pl.BlockSpec((M, WCi), lambda n: (n, 0)),
        const_spec(m1.shape), const_spec(m2.shape), const_spec(aff.shape),
        const_spec(sd2.shape), const_spec(srow.shape),
        const_spec(rmat.shape), const_spec(bmat.shape),
    ]
    args = [x_p, m1, m2, aff, sd2, srow, rmat, bmat]
    if use_emat:
        in_specs.append(const_spec(emat.shape))
        args.append(emat)

    out = pl.pallas_call(
        kernel,
        out_shape=jax.ShapeDtypeStruct((N * H, WC), jnp.float32),
        grid_spec=pltpu.PrefetchScalarGridSpec(
            num_scalar_prefetch=0,
            grid=(N // bb,),
            in_specs=in_specs,
            out_specs=pl.BlockSpec((M, WC), lambda n: (n, 0)),
        ),
        compiler_params=pltpu.CompilerParams(
            dimension_semantics=("parallel",),
            vmem_limit_bytes=32 * 1024 * 1024),
    )(*args)

    return out.reshape(N, H, W, Cout)


def ref_conv_block(x, params, *, groups, eps=1e-5, conv_dtype=jnp.float32):
    """Pure-JAX reference (NHWC) mirroring the PyTorch module.  conv_dtype
    selects the conv operand precision (f32, or bf16 to match the kernel's
    MXU-operand regime); accumulation and GN/SiLU stay f32."""
    w1, b1, g1, be1, w2, b2, g2, be2 = params

    def conv(x, w, b):
        y = jax.lax.conv_general_dilated(
            x.astype(conv_dtype), w.astype(conv_dtype),
            window_strides=(1, 1), padding="SAME",
            dimension_numbers=("NHWC", "HWIO", "NHWC"),
            preferred_element_type=jnp.float32)
        return y + b

    def gn(y, gamma, beta):
        N, H, W, C = y.shape
        cpg = C // groups
        yr = y.reshape(N, H, W, groups, cpg)
        mean = yr.mean(axis=(1, 2, 4), keepdims=True)
        var = yr.var(axis=(1, 2, 4), keepdims=True)
        yn = ((yr - mean) / jnp.sqrt(var + eps)).reshape(N, H, W, C)
        return yn * gamma + beta

    silu = lambda v: v * jax.nn.sigmoid(v)
    y = silu(gn(conv(x, w1, b1), g1, be1))
    y = silu(gn(conv(y, w2, b2), g2, be2))
    return y


if __name__ == "__main__":
    # Shapes consistent with the module: batch=2, in_ch=4, out_ch=8, 16x16.
    N, H, W = 2, 16, 16
    in_ch, out_ch = 4, 8
    groups = min(32, out_ch)   # as in nn.GroupNorm(min(32, out_ch), out_ch)

    key = jax.random.PRNGKey(0)
    ks = jax.random.split(key, 9)
    x = jax.random.normal(ks[0], (N, H, W, in_ch), jnp.float32)
    w1 = 0.2 * jax.random.normal(ks[1], (3, 3, in_ch, out_ch), jnp.float32)
    b1 = 0.1 * jax.random.normal(ks[2], (out_ch,), jnp.float32)
    g1 = 1.0 + 0.1 * jax.random.normal(ks[3], (out_ch,), jnp.float32)
    be1 = 0.1 * jax.random.normal(ks[4], (out_ch,), jnp.float32)
    w2 = 0.2 * jax.random.normal(ks[5], (3, 3, out_ch, out_ch), jnp.float32)
    b2 = 0.1 * jax.random.normal(ks[6], (out_ch,), jnp.float32)
    g2 = 1.0 + 0.1 * jax.random.normal(ks[7], (out_ch,), jnp.float32)
    be2 = 0.1 * jax.random.normal(ks[8], (out_ch,), jnp.float32)
    params = (w1, b1, g1, be1, w2, b2, g2, be2)

    # 1) Exact-math configuration (f32 MXU operands): tight check against the
    #    f32 reference that mirrors the PyTorch module.
    out_f32 = jax.block_until_ready(
        conv_block(x, params, groups=groups, mxu_dtype=jnp.float32))
    ref_f32 = ref_conv_block(x, params, groups=groups)
    assert out_f32.shape == (N, H, W, out_ch), out_f32.shape
    err32 = float(jnp.max(jnp.abs(out_f32 - ref_f32)))
    assert jnp.allclose(out_f32, ref_f32, atol=5e-4, rtol=5e-4), \
        f"f32 path max abs err = {err32}"

    # 2) Performance configuration (bf16 MXU operands, f32 accumulate/GN/SiLU):
    #    checked against a reference running in the same numerics regime.
    out_bf16 = jax.block_until_ready(
        conv_block(x, params, groups=groups, mxu_dtype=jnp.bfloat16))
    ref_bf16 = ref_conv_block(x, params, groups=groups, conv_dtype=jnp.bfloat16)
    errbf = float(jnp.max(jnp.abs(out_bf16 - ref_bf16)))
    assert jnp.allclose(out_bf16, ref_bf16, atol=2e-2, rtol=2e-2), \
        f"bf16 path max abs err = {errbf}"

    print("KERNEL_OK")
</pallas_src>

<mosaic_0001>
module attributes {stable_mosaic.version = 11 : i64} {
  func.func @kernel(%arg0: i32, %arg1: memref<16x64xf32, #tpu.memory_space<vmem>>, %arg2: memref<64x384xf32, #tpu.memory_space<vmem>>, %arg3: memref<128x384xf32, #tpu.memory_space<vmem>>, %arg4: memref<6x128xf32, #tpu.memory_space<vmem>>, %arg5: memref<16x32xf32, #tpu.memory_space<vmem>>, %arg6: memref<2x32xf32, #tpu.memory_space<vmem>>, %arg7: memref<128x128xf32, #tpu.memory_space<vmem>>, %arg8: memref<128x128xf32, #tpu.memory_space<vmem>>, %arg9: memref<16x128xf32, #tpu.memory_space<vmem>>) attributes {dimension_semantics = [#tpu.dimension_semantics<parallel>], iteration_bounds = array<i64: 2>, scalar_prefetch = 0 : i64, scratch_operands = 0 : i64, tpu.core_type = #tpu.core_type<tc>, window_params = [{transform_indices = @transform_0, window_bounds = array<i64: 16, 64>}, {pipeline_mode = #tpu.pipeline_mode<synchronous>, transform_indices = @transform_1, window_bounds = array<i64: 64, 384>}, {pipeline_mode = #tpu.pipeline_mode<synchronous>, transform_indices = @transform_2, window_bounds = array<i64: 128, 384>}, {pipeline_mode = #tpu.pipeline_mode<synchronous>, transform_indices = @transform_3, window_bounds = array<i64: 6, 128>}, {pipeline_mode = #tpu.pipeline_mode<synchronous>, transform_indices = @transform_4, window_bounds = array<i64: 16, 32>}, {pipeline_mode = #tpu.pipeline_mode<synchronous>, transform_indices = @transform_5, window_bounds = array<i64: 2, 32>}, {pipeline_mode = #tpu.pipeline_mode<synchronous>, transform_indices = @transform_6, window_bounds = array<i64: 128, 128>}, {pipeline_mode = #tpu.pipeline_mode<synchronous>, transform_indices = @transform_7, window_bounds = array<i64: 128, 128>}, {transform_indices = @transform_8, window_bounds = array<i64: 16, 128>}]} {
    %c0 = arith.constant 0 : index
    %c0_0 = arith.constant 0 : index
    %0 = vector.load %arg4[%c0, %c0_0] : memref<6x128xf32, #tpu.memory_space<vmem>>, vector<6x128xf32>
    %c0_1 = arith.constant 0 : index
    %c0_2 = arith.constant 0 : index
    %1 = vector.load %arg5[%c0_1, %c0_2] : memref<16x32xf32, #tpu.memory_space<vmem>>, vector<16x32xf32>
    %c0_3 = arith.constant 0 : index
    %c0_4 = arith.constant 0 : index
    %2 = vector.load %arg6[%c0_3, %c0_4] : memref<2x32xf32, #tpu.memory_space<vmem>>, vector<2x32xf32>
    %c0_5 = arith.constant 0 : index
    %c0_6 = arith.constant 0 : index
    %3 = vector.load %arg7[%c0_5, %c0_6] : memref<128x128xf32, #tpu.memory_space<vmem>>, vector<128x128xf32>
    %c0_7 = arith.constant 0 : index
    %c0_8 = arith.constant 0 : index
    %4 = vector.load %arg8[%c0_7, %c0_8] : memref<128x128xf32, #tpu.memory_space<vmem>>, vector<128x128xf32>
    %c0_9 = arith.constant 0 : index
    %c0_10 = arith.constant 0 : index
    %5 = vector.load %arg1[%c0_9, %c0_10] : memref<16x64xf32, #tpu.memory_space<vmem>>, vector<16x64xf32>
    %6 = vector.extract_strided_slice %0 {offsets = [0, 0], sizes = [1, 128], strides = [1, 1]} : vector<6x128xf32> to vector<1x128xf32>
    %c0_11 = arith.constant 0 : index
    %c0_12 = arith.constant 0 : index
    %7 = vector.load %arg2[%c0_11, %c0_12] : memref<64x384xf32, #tpu.memory_space<vmem>>, vector<64x384xf32>
    %cst = arith.constant dense<0.000000e+00> : vector<16x384xf32>
    %8 = tpu.matmul %5, %7, %cst {dimension_numbers = #tpu.dot_dimension_numbers<[1], [0], [0], [1], [0, 0, 1, 1], [], []>} : vector<16x64xf32>, vector<64x384xf32>, vector<16x384xf32> -> vector<16x384xf32>
    %9 = vector.extract_strided_slice %8 {offsets = [0, 0], sizes = [16, 128], strides = [1, 1]} : vector<16x384xf32> to vector<16x128xf32>
    %10 = vector.extract_strided_slice %8 {offsets = [0, 256], sizes = [16, 128], strides = [1, 1]} : vector<16x384xf32> to vector<16x128xf32>
    %11 = tpu.concatenate %9, %10 in 0 : vector<16x128xf32>, vector<16x128xf32> -> vector<32x128xf32>
    %cst_13 = arith.constant dense<0.000000e+00> : vector<16x128xf32>
    %12 = tpu.matmul %1, %11, %cst_13 {dimension_numbers = #tpu.dot_dimension_numbers<[1], [0], [0], [1], [0, 0, 1, 1], [], []>} : vector<16x32xf32>, vector<32x128xf32>, vector<16x128xf32> -> vector<16x128xf32>
    %13 = vector.extract_strided_slice %8 {offsets = [0, 128], sizes = [16, 128], strides = [1, 1]} : vector<16x384xf32> to vector<16x128xf32>
    %14 = arith.addf %13, %12 : vector<16x128xf32>
    %15 = vector.broadcast %6 : vector<1x128xf32> to vector<16x128xf32>
    %16 = arith.addf %14, %15 : vector<16x128xf32>
    %17 = vector.extract_strided_slice %0 {offsets = [1, 0], sizes = [1, 128], strides = [1, 1]} : vector<6x128xf32> to vector<1x128xf32>
    %18 = vector.extract_strided_slice %0 {offsets = [2, 0], sizes = [1, 128], strides = [1, 1]} : vector<6x128xf32> to vector<1x128xf32>
    %19 = arith.mulf %16, %16 : vector<16x128xf32>
    %20 = tpu.concatenate %16, %19 in 0 : vector<16x128xf32>, vector<16x128xf32> -> vector<32x128xf32>
    %cst_14 = arith.constant dense<0.000000e+00> : vector<2x128xf32>
    %21 = tpu.matmul %2, %20, %cst_14 {dimension_numbers = #tpu.dot_dimension_numbers<[1], [0], [0], [1], [0, 0, 1, 1], [], []>} : vector<2x32xf32>, vector<32x128xf32>, vector<2x128xf32> -> vector<2x128xf32>
    %cst_15 = arith.constant dense<0.000000e+00> : vector<2x128xf32>
    %22 = tpu.matmul %21, %3, %cst_15 {dimension_numbers = #tpu.dot_dimension_numbers<[1], [0], [0], [1], [0, 0, 1, 1], [], []>} : vector<2x128xf32>, vector<128x128xf32>, vector<2x128xf32> -> vector<2x128xf32>
    %23 = vector.extract_strided_slice %22 {offsets = [0, 0], sizes = [1, 128], strides = [1, 1]} : vector<2x128xf32> to vector<1x128xf32>
    %24 = vector.extract_strided_slice %22 {offsets = [1, 0], sizes = [1, 128], strides = [1, 1]} : vector<2x128xf32> to vector<1x128xf32>
    %25 = arith.mulf %23, %23 : vector<1x128xf32>
    %26 = arith.subf %24, %25 : vector<1x128xf32>
    %cst_16 = arith.constant 0.000000e+00 : f32
    %27 = vector.broadcast %cst_16 : f32 to vector<1x128xf32>
    %28 = arith.maximumf %26, %27 : vector<1x128xf32>
    %cst_17 = arith.constant 9.99999974E-6 : f32
    %29 = vector.broadcast %cst_17 : f32 to vector<1x128xf32>
    %30 = arith.addf %28, %29 : vector<1x128xf32>
    %31 = math.rsqrt %30 : vector<1x128xf32>
    %cst_18 = arith.constant 0.000000e+00 : f32
    %32 = vector.broadcast %cst_18 : f32 to vector<1x128xf32>
    %33 = arith.subf %32, %23 : vector<1x128xf32>
    %34 = arith.mulf %33, %31 : vector<1x128xf32>
    %35 = tpu.concatenate %31, %34 in 0 : vector<1x128xf32>, vector<1x128xf32> -> vector<2x128xf32>
    %cst_19 = arith.constant dense<0.000000e+00> : vector<2x128xf32>
    %36 = tpu.matmul %35, %4, %cst_19 {dimension_numbers = #tpu.dot_dimension_numbers<[1], [0], [0], [1], [0, 0, 1, 1], [], []>} : vector<2x128xf32>, vector<128x128xf32>, vector<2x128xf32> -> vector<2x128xf32>
    %37 = vector.extract_strided_slice %36 {offsets = [0, 0], sizes = [1, 128], strides = [1, 1]} : vector<2x128xf32> to vector<1x128xf32>
    %38 = arith.mulf %37, %17 : vector<1x128xf32>
    %39 = vector.extract_strided_slice %36 {offsets = [1, 0], sizes = [1, 128], strides = [1, 1]} : vector<2x128xf32> to vector<1x128xf32>
    %40 = arith.mulf %39, %17 : vector<1x128xf32>
    %41 = arith.addf %40, %18 : vector<1x128xf32>
    %42 = vector.broadcast %38 : vector<1x128xf32> to vector<16x128xf32>
    %43 = arith.mulf %16, %42 : vector<16x128xf32>
    %44 = vector.broadcast %41 : vector<1x128xf32> to vector<16x128xf32>
    %45 = arith.addf %43, %44 : vector<16x128xf32>
    %46 = arith.negf %45 : vector<16x128xf32>
    %47 = math.exp %46 : vector<16x128xf32>
    %cst_20 = arith.constant 1.000000e+00 : f32
    %48 = vector.broadcast %cst_20 : f32 to vector<16x128xf32>
    %49 = arith.addf %48, %47 : vector<16x128xf32>
    %50 = arith.divf %48, %49 : vector<16x128xf32>
    %51 = arith.mulf %45, %50 : vector<16x128xf32>
    %52 = vector.extract_strided_slice %0 {offsets = [3, 0], sizes = [1, 128], strides = [1, 1]} : vector<6x128xf32> to vector<1x128xf32>
    %c0_21 = arith.constant 0 : index
    %c0_22 = arith.constant 0 : index
    %53 = vector.load %arg3[%c0_21, %c0_22] : memref<128x384xf32, #tpu.memory_space<vmem>>, vector<128x384xf32>
    %cst_23 = arith.constant dense<0.000000e+00> : vector<16x384xf32>
    %54 = tpu.matmul %51, %53, %cst_23 {dimension_numbers = #tpu.dot_dimension_numbers<[1], [0], [0], [1], [0, 0, 1, 1], [], []>} : vector<16x128xf32>, vector<128x384xf32>, vector<16x384xf32> -> vector<16x384xf32>
    %55 = vector.extract_strided_slice %54 {offsets = [0, 0], sizes = [16, 128], strides = [1, 1]} : vector<16x384xf32> to vector<16x128xf32>
    %56 = vector.extract_strided_slice %54 {offsets = [0, 256], sizes = [16, 128], strides = [1, 1]} : vector<16x384xf32> to vector<16x128xf32>
    %57 = tpu.concatenate %55, %56 in 0 : vector<16x128xf32>, vector<16x128xf32> -> vector<32x128xf32>
    %cst_24 = arith.constant dense<0.000000e+00> : vector<16x128xf32>
    %58 = tpu.matmul %1, %57, %cst_24 {dimension_numbers = #tpu.dot_dimension_numbers<[1], [0], [0], [1], [0, 0, 1, 1], [], []>} : vector<16x32xf32>, vector<32x128xf32>, vector<16x128xf32> -> vector<16x128xf32>
    %59 = vector.extract_strided_slice %54 {offsets = [0, 128], sizes = [16, 128], strides = [1, 1]} : vector<16x384xf32> to vector<16x128xf32>
    %60 = arith.addf %59, %58 : vector<16x128xf32>
    %61 = vector.broadcast %52 : vector<1x128xf32> to vector<16x128xf32>
    %62 = arith.addf %60, %61 : vector<16x128xf32>
    %63 = vector.extract_strided_slice %0 {offsets = [4, 0], sizes = [1, 128], strides = [1, 1]} : vector<6x128xf32> to vector<1x128xf32>
    %64 = vector.extract_strided_slice %0 {offsets = [5, 0], sizes = [1, 128], strides = [1, 1]} : vector<6x128xf32> to vector<1x128xf32>
    %65 = arith.mulf %62, %62 : vector<16x128xf32>
    %66 = tpu.concatenate %62, %65 in 0 : vector<16x128xf32>, vector<16x128xf32> -> vector<32x128xf32>
    %cst_25 = arith.constant dense<0.000000e+00> : vector<2x128xf32>
    %67 = tpu.matmul %2, %66, %cst_25 {dimension_numbers = #tpu.dot_dimension_numbers<[1], [0], [0], [1], [0, 0, 1, 1], [], []>} : vector<2x32xf32>, vector<32x128xf32>, vector<2x128xf32> -> vector<2x128xf32>
    %cst_26 = arith.constant dense<0.000000e+00> : vector<2x128xf32>
    %68 = tpu.matmul %67, %3, %cst_26 {dimension_numbers = #tpu.dot_dimension_numbers<[1], [0], [0], [1], [0, 0, 1, 1], [], []>} : vector<2x128xf32>, vector<128x128xf32>, vector<2x128xf32> -> vector<2x128xf32>
    %69 = vector.extract_strided_slice %68 {offsets = [0, 0], sizes = [1, 128], strides = [1, 1]} : vector<2x128xf32> to vector<1x128xf32>
    %70 = vector.extract_strided_slice %68 {offsets = [1, 0], sizes = [1, 128], strides = [1, 1]} : vector<2x128xf32> to vector<1x128xf32>
    %71 = arith.mulf %69, %69 : vector<1x128xf32>
    %72 = arith.subf %70, %71 : vector<1x128xf32>
    %cst_27 = arith.constant 0.000000e+00 : f32
    %73 = vector.broadcast %cst_27 : f32 to vector<1x128xf32>
    %74 = arith.maximumf %72, %73 : vector<1x128xf32>
    %cst_28 = arith.constant 9.99999974E-6 : f32
    %75 = vector.broadcast %cst_28 : f32 to vector<1x128xf32>
    %76 = arith.addf %74, %75 : vector<1x128xf32>
    %77 = math.rsqrt %76 : vector<1x128xf32>
    %cst_29 = arith.constant 0.000000e+00 : f32
    %78 = vector.broadcast %cst_29 : f32 to vector<1x128xf32>
    %79 = arith.subf %78, %69 : vector<1x128xf32>
    %80 = arith.mulf %79, %77 : vector<1x128xf32>
    %81 = tpu.concatenate %77, %80 in 0 : vector<1x128xf32>, vector<1x128xf32> -> vector<2x128xf32>
    %cst_30 = arith.constant dense<0.000000e+00> : vector<2x128xf32>
    %82 = tpu.matmul %81, %4, %cst_30 {dimension_numbers = #tpu.dot_dimension_numbers<[1], [0], [0], [1], [0, 0, 1, 1], [], []>} : vector<2x128xf32>, vector<128x128xf32>, vector<2x128xf32> -> vector<2x128xf32>
    %83 = vector.extract_strided_slice %82 {offsets = [0, 0], sizes = [1, 128], strides = [1, 1]} : vector<2x128xf32> to vector<1x128xf32>
    %84 = arith.mulf %83, %63 : vector<1x128xf32>
    %85 = vector.extract_strided_slice %82 {offsets = [1, 0], sizes = [1, 128], strides = [1, 1]} : vector<2x128xf32> to vector<1x128xf32>
    %86 = arith.mulf %85, %63 : vector<1x128xf32>
    %87 = arith.addf %86, %64 : vector<1x128xf32>
    %88 = vector.broadcast %84 : vector<1x128xf32> to vector<16x128xf32>
    %89 = arith.mulf %62, %88 : vector<16x128xf32>
    %90 = vector.broadcast %87 : vector<1x128xf32> to vector<16x128xf32>
    %91 = arith.addf %89, %90 : vector<16x128xf32>
    %92 = arith.negf %91 : vector<16x128xf32>
    %93 = math.exp %92 : vector<16x128xf32>
    %cst_31 = arith.constant 1.000000e+00 : f32
    %94 = vector.broadcast %cst_31 : f32 to vector<16x128xf32>
    %95 = arith.addf %94, %93 : vector<16x128xf32>
    %96 = arith.divf %94, %95 : vector<16x128xf32>
    %97 = arith.mulf %91, %96 : vector<16x128xf32>
    %c0_32 = arith.constant 0 : index
    %c0_33 = arith.constant 0 : index
    %98 = vector.load %arg9[%c0_32, %c0_33] : memref<16x128xf32, #tpu.memory_space<vmem>>, vector<16x128xf32>
    tpu.vector_store %arg9[%c0_32, %c0_33], %97 {strides = array<i32>} : memref<16x128xf32, #tpu.memory_space<vmem>>, vector<16x128xf32>,
    return
  }
  func.func @transform_0(%arg0: i32) -> (i32, i32) {
    %c0_i32 = arith.constant 0 : i32
    %c0_i32_0 = arith.constant 0 : i32
    return %arg0, %c0_i32 : i32, i32
  }
  func.func @transform_1(%arg0: i32) -> (i32, i32) {
    %c0_i32 = arith.constant 0 : i32
    %c0_i32_0 = arith.constant 0 : i32
    %c0_i32_1 = arith.constant 0 : i32
    return %c0_i32, %c0_i32_0 : i32, i32
  }
  func.func @transform_2(%arg0: i32) -> (i32, i32) {
    %c0_i32 = arith.constant 0 : i32
    %c0_i32_0 = arith.constant 0 : i32
    %c0_i32_1 = arith.constant 0 : i32
    return %c0_i32, %c0_i32_0 : i32, i32
  }
  func.func @transform_3(%arg0: i32) -> (i32, i32) {
    %c0_i32 = arith.constant 0 : i32
    %c0_i32_0 = arith.constant 0 : i32
    %c0_i32_1 = arith.constant 0 : i32
    return %c0_i32, %c0_i32_0 : i32, i32
  }
  func.func @transform_4(%arg0: i32) -> (i32, i32) {
    %c0_i32 = arith.constant 0 : i32
    %c0_i32_0 = arith.constant 0 : i32
    %c0_i32_1 = arith.constant 0 : i32
    return %c0_i32, %c0_i32_0 : i32, i32
  }
  func.func @transform_5(%arg0: i32) -> (i32, i32) {
    %c0_i32 = arith.constant 0 : i32
    %c0_i32_0 = arith.constant 0 : i32
    %c0_i32_1 = arith.constant 0 : i32
    return %c0_i32, %c0_i32_0 : i32, i32
  }
  func.func @transform_6(%arg0: i32) -> (i32, i32) {
    %c0_i32 = arith.constant 0 : i32
    %c0_i32_0 = arith.constant 0 : i32
    %c0_i32_1 = arith.constant 0 : i32
    return %c0_i32, %c0_i32_0 : i32, i32
  }
  func.func @transform_7(%arg0: i32) -> (i32, i32) {
    %c0_i32 = arith.constant 0 : i32
    %c0_i32_0 = arith.constant 0 : i32
    %c0_i32_1 = arith.constant 0 : i32
    return %c0_i32, %c0_i32_0 : i32, i32
  }
  func.func @transform_8(%arg0: i32) -> (i32, i32) {
    %c0_i32 = arith.constant 0 : i32
    %c0_i32_0 = arith.constant 0 : i32
    return %arg0, %c0_i32 : i32, i32
  }
}

</mosaic_0001>

<bundles_post_ra>
// kernel: tpu_custom_call.1
= control target key start
LH: loop header
LB: loop body
LE: loop exit
PB: predicated region body
PF: predicated region fallthrough
CT: control target
= control target key end

     0   :  { %s2078_s0 = inlined_call_operand.hbm [shape: f32[32,64], index: 0, kind: input, shape index: {}]   ;;  %s2079_s1 = inlined_call_operand.hbm [shape: f32[64,384], index: 1, kind: input, shape index: {}]   ;;  %s2080_s2 = inlined_call_operand.hbm [shape: f32[128,384], index: 2, kind: input, shape index: {}]   ;;  %s2081_s3 = inlined_call_operand.hbm [shape: f32[6,128], index: 3, kind: input, shape index: {}]   ;;  %s2082_s4 = inlined_call_operand.hbm [shape: f32[16,32], index: 4, kind: input, shape index: {}]   ;;  %s2083_s5 = inlined_call_operand.vmem [shape: f32[2,32], index: 5, kind: input, shape index: {}]   ;;  %s2084_s6 = inlined_call_operand.hbm [shape: f32[128,128], index: 6, kind: input, shape index: {}]   ;;  %s2085_s7 = inlined_call_operand.hbm [shape: f32[128,128], index: 7, kind: input, shape index: {}]   ;;  %s2086_s8 = inlined_call_operand.hbm [shape: f32[32,128], index: 8, kind: output, shape index: {}]  }
   0x1   :  { %2089 = sst [smem:[#allocation20_spill]] %s2079_s1 }
   0x2   :  { %2090 = sst [smem:[#allocation21_spill]] %s2080_s2 }
   0x3   :  { %2091 = sst [smem:[#allocation22_spill]] %s2081_s3 }
   0x4   :  { %13 = vsyncpa [#allocation3], 0 }
   0x5   :  { %15 = vsyncpa [#allocation3 + $0x1], 0 }
   0x6   :  { %16 = vsyncpa [#allocation6], 0 }
   0x7   :  { %17 = vsyncpa [#allocation9], 0 }
   0x8   :  { %18 = vsyncpa [#allocation12], 0 }
   0x9   :  { %19 = vsyncpa [#allocation4], 0 }
   0xa   :  { %21 = vsyncpa [#allocation4 + $0x1], 0  ;;  %s1700_s27 = smov 0   ;;  %s1702_s28 = smov 0  }
   0xb   :  { %s1704_s29 = smov 0   ;;  %s1706_s30 = smov 0  }
   0xc LB: > { %s2092_s1 = sld [smem:[#allocation20_spill]]  ;;  %s1724_s12 = sadd.s32 4294967295, %s1641_s30   ;;  %s1641_s30 = sphi %s1706_s30, %s2108_s30   ;;  %s1637_s29 = sphi %s1704_s29, %s2107_s29   ;;  %s1633_s28 = sphi %s1702_s28, %s2106_s28   ;;  %s1629_s27 = sphi %s1700_s27, %s2105_s27  }
   0xd   : > { %p1177_p0 = scmp.ge.s32.totalorder %s1641_s30, 1  ;;  %p48_p1 = scmp.eq.s32.totalorder %s1724_s12, 0 }
   0xe   : > { %p231_p2 = scmp.lt.s32.totalorder %s1641_s30, 3  ;;  %s1643_s14 = smov [#allocation5]  }
   0xf   : > { %s244_s15 = sshll.u32 %s1643_s14, 4  ;;  %s2094_s3 = sld [smem:[#allocation22_spill]]  ;;  %s245_s15 = int_to_ptr.vmem [resolvable:$true] %s244_s15 }
  0x10   : > { %p1729_p3 = pnand %p1177_p0, %p231_p2  ;;  %s1644_s20 = smov [#allocation8]  }
  0x11   : > { %s273_s21 = sshll.u32 %s1644_s20, 4  ;;  %s1645_s22 = smov 384   ;;  %s274_s21 = int_to_ptr.vmem [resolvable:$true] %s273_s21 }
  0x12   : > { %s242_s11 = sshll.u32 %s2092_s1, 4  ;;  %p1248_p4 = pneg %p1729_p3  ;;  %s243_s11 = int_to_ptr.hbm [resolvable:$true] %s242_s11 }
  0x13   : > { %s1646_s23 = smov 24   ;;  %s299_s26 = sshll.u32 %s2084_s6, 4  ;;  %s300_s26 = int_to_ptr.hbm [resolvable:$true] %s299_s26 }
  0x14   : > { %p1741_p6 = pnand %p1248_p4, %p48_p1  ;;  %s1647_s9 = smov [#allocation11]  }
  0x15   : > { %s271_s18 = sshll.u32 %s2094_s3, 4  ;;  %s301_s10 = sshll.u32 %s1647_s9, 4  ;;  %s272_s18 = int_to_ptr.hbm [resolvable:$true] %s271_s18  ;;  %s302_s10 = int_to_ptr.vmem [resolvable:$true] %s301_s10 }
  0x16   : > { %1251 = dma.hbm_to_vmem [thread:$0]  (!%p1741_p6), %s243_s11, 3072, %s245_s15, [#allocation6], %s1645_s22, %s1645_s22, %s1646_s23  }
  0x17   : > { %1257 = dma.hbm_to_vmem [thread:$0]  (!%p1741_p6), %s272_s18, 128, %s274_s21, [#allocation9]  }
  0x18   : > { %s2096_s2 = sld [smem:[#allocation21_spill]]  ;;  %s2087_s20 = smov 128  }
  0x19   : > { %s2088_s1 = smov 8   ;;  %s1650_s11 = smov [#allocation7]  }
  0x1a   : > { %1263 = dma.hbm_to_vmem [thread:$0]  (!%p1741_p6), %s300_s26, 2048, %s302_s10, [#allocation12], %s2087_s20, %s2087_s20, %s2088_s1  }
  0x1b   : > { %s258_s15 = sshll.u32 %s1650_s11, 4  ;;  %s282_s24 = sshll.u32 %s2082_s4, 4  ;;  %s259_s15 = int_to_ptr.vmem [resolvable:$true] %s258_s15  ;;  %s283_s24 = int_to_ptr.hbm [resolvable:$true] %s282_s24 }
  0x1c   : > { %s313_s26 = sshll.u32 %s2085_s7, 4  ;;  %s1651_s10 = smov [#allocation10]   ;;  %s314_s26 = int_to_ptr.hbm [resolvable:$true] %s313_s26 }
  0x1d   : > { %s284_s14 = sshll.u32 %s1651_s10, 4  ;;  %s1176_s16 = sadd.s32 4294967294, %s1641_s30   ;;  %s285_s14 = int_to_ptr.vmem [resolvable:$true] %s284_s14 }
  0x1e   : > { %s256_s17 = sshll.u32 %s2096_s2, 4  ;;  %p41_p8 = scmp.ne.s32.totalorder %s1637_s29, %s1633_s28  ;;  %s257_s17 = int_to_ptr.hbm [resolvable:$true] %s256_s17 }
  0x1f   : > { %1254 = dma.hbm_to_vmem [thread:$0]  (!%p1741_p6), %s257_s17, 6144, %s259_s15, [#allocation6], %s1645_s22, %s1645_s22, %s1646_s23  }
  0x20   : > { %1260 = dma.hbm_to_vmem [thread:$0]  (!%p1741_p6), %s283_s24, 256, %s285_s14, [#allocation9], %s2087_s20, %s2087_s20, %s2088_s1  }
  0x21   : > { %s1652_s22 = smov [#allocation13]   ;;  %s1780_s17 = sadd.s32 1, %s1641_s30  }
  0x22   : > { %s315_s23 = sshll.u32 %s1652_s22, 4  ;;  %s31_s11 = ssub.s32 %s1641_s30, %s1780_s17  ;;  %s316_s23 = int_to_ptr.vmem [resolvable:$true] %s315_s23 }
  0x23   : > { %1266 = dma.hbm_to_vmem [thread:$0]  (!%p1741_p6), %s314_s26, 2048, %s316_s23, [#allocation12], %s2087_s20, %s2087_s20, %s2088_s1  }
  0x24   : > { %s34_s15 = sadd.s32 1, %s1637_s29  ;;  %p32_p7 = scmp.eq.s32.totalorder %s31_s11, 0 }
  0x25   : > { %p42_p9 = scmp.eq.s32.totalorder %s1641_s30, 0  ;;  %p47_p10 = scmp.ne.s32.totalorder %s1633_s28, %s1629_s27 }
  0x26   : > { %s1791_s18 = scalar_select %p32_p7, %s1637_s29, %s34_s15  }
  0x27   : > { %p1793_p11 = por %p42_p9, %p41_p8  ;;  %p1799_p12 = por %p48_p1, %p47_p10 }
  0x28   : > { %p218_p13 = scmp.eq.s32.totalorder %s1724_s12, 1  ;;  %p224_p0 = scmp.eq.s32.totalorder %s1176_s16, 1 }
  0x29   : > { %p1281_p2 = scmp.lt.s32.totalorder %s1641_s30, 2  ;;  %s329_s24 = sand.u32 1, %s1637_s29  }
  0x2a   : > { %p1806_p4 = por %p218_p13, %p41_p8  ;;  %p1810_p6 = por %p224_p0, %p47_p10 }
  0x2b   : > { %s1185_s26 = sshll.u32 %s329_s24, 4  ;;  %s1218_s10 = sshll.u32 %s1641_s30, 4 }
  0x2c   : > { %s338_s23 = scalar_lea.hbm %s2078_s0, %s1218_s10  ;;  %s333_s11 = scalar_lea.vmem [#allocation2], %s1185_s26 }
  0x2d   : > { %s341_s15 = sshll.u32 %s333_s11, 4  ;;  %s339_s20 = sshll.u32 %s338_s23, 4  ;;  %s342_s15 = int_to_ptr.vmem [resolvable:$true] %s341_s15  ;;  %s340_s20 = int_to_ptr.hbm [resolvable:$true] %s339_s20 }
  0x2e   : > { %p1820_p7 = pnand %p1281_p2, %p1793_p11  ;;  %s330_s1 = scalar_lea.sflag [#allocation3], %s329_s24 }
  0x2f   : > { %s1533_s2 = sshra.s32 %s340_s20, 4  ;;  %s1540_s14 = scalar_lea.hbm %s2078_s0, 32  ;;  %s1534_s2 = int_to_ptr.hbm [resolvable:$true] %s1533_s2 }
  0x30   : > { %s1535_s3 = scalar_lea.hbm %s1534_s2, 16  ;;  %p1537_p9 = pneg %p1820_p7 }
  0x31   : > { %p1536_p8 = scmp.ne.s32.totalorder %s1534_s2, %s1535_s3  ;;  %p1541_p11 = scmp.lt.s32.totalorder %s1534_s2, %s2078_s0 }
  0x32   : > { %p1542_p0 = scmp.lt.s32.totalorder %s1540_s14, %s1535_s3 }
  0x33   : > { %p1538_p10 = pnand %p1537_p9, %p1536_p8 }
  0x34   : > { %p1543_p2 = por %p1542_p0, %p1541_p11 }
  0x35   : > { %p1539_p13 = pneg %p1538_p10 }
  0x37   : > { %p1544_p5 = pnand %p1543_p2, %p1539_p13 }
  0x39   : > { %1547 = shalt.err (!%p1544_p5)
}
  0x3a   : > { %s2102_s24 = smov 8   ;;  %s2103_s23 = smov 128  }
  0x3b   : > { %1270 = dma.hbm_to_vmem [thread:$0]  (!%p1820_p7), %s340_s20, 256, %s342_s15, %s330_s1, %s2103_s23, %s2103_s23, %s2102_s24  }
  0x3c   : > { %353 = sbr.rel (%p1729_p3) target bundleno = 1619 (0x653), region = 52  ;;  %s1840_s11 = sand.u32 (!%p1729_p3), 1, %s1633_s28  }
  0x3d   : > { %s1189_s2 = sshll.u32 (!%p1729_p3), %s1840_s11, 4  ;;  %s356_s3 = scalar_lea.sflag (!%p1729_p3), [#allocation3], %s1840_s11 }
  0x3e   : > { %s1846_s26 = scalar_lea.vmem (!%p1729_p3), [#allocation2], %s1189_s2 }
  0x41   : > { %1608 = dma.done.wait (%p1799_p12), %s356_s3, 256  }
  0x42   : > { %1610 = vsyncadd (%p1799_p12), %s356_s3, 4294967040 }
  0x43   : > { %1612 = dma.done.wait (%p48_p1), [#allocation6], 9216  }
  0x44   : > { %1614 = vsyncadd (%p48_p1), [#allocation6], 4294958080 }
  0x45   : > { %1616 = dma.done.wait (%p48_p1), [#allocation9], 384  }
  0x46   : > { %1618 = vsyncadd (%p48_p1), [#allocation9], 4294966912 }
  0x47   : > { %1620 = dma.done.wait (%p48_p1), [#allocation12], 4096  }
  0x48   : > { %1622 = vsyncadd (%p48_p1), [#allocation12], 4294963200  ;;  %v484_v0 = vld [vmem:[#allocation5 + $0xa8] sm:$0xff]  ;;  %v481_v1 = vld [vmem:[#allocation5 + $0x90] sm:$0xff]  ;;  %vm487_vm0 = vcmask 523264   ;;  %vm563_vm1 = vcmask 261120  }
  0x49   : > { %502 = vmatpush.msra.mxu2 %v484_v0  ;;  %v478_v2 = vld [vmem:[#allocation5 + $0x78] sm:$0xff]  ;;  %v475_v3 = vld [vmem:[#allocation5 + $0x60] sm:$0xff]  ;;  %v472_v4 = vld [vmem:[#allocation5 + $0x48] sm:$0xff]  ;;  %vm668_vm5 = vcmask 1040384   ;;  %s1219_s20 = sshll.u32 %s1724_s12, 4  ;;  %s422_s12 = scalar_lea.vmem [#allocation14], %s1189_s2 }
  0x4a   : > { %v469_v5 = vld [vmem:[#allocation5 + $0x30] sm:$0xff]  ;;  %v466_v6 = vld [vmem:[#allocation5 + $0x18] sm:$0xff]  ;;  %v463_v7 = vld [vmem:[#allocation5] sm:$0xff]  ;;  %s1042_s16 = scalar_lea.hbm %s2086_s8, %s1219_s20  ;;  %s1043_s10 = sshll.u32 %s422_s12, 4  ;;  %s1044_s10 = int_to_ptr.vmem [resolvable:$true] %s1043_s10 }
  0x4b   : > { %503 = vmatpush.msra.mxu2 %v481_v1  ;;  %v461_v8 = vld [vmem:[%s1846_s26] sm:$0xff]  ;;  %v486_v9 = vld [vmem:[#allocation5 + $0xb8] sm:$0xff]  ;;  %v480_v11 = vld [vmem:[#allocation5 + $0x88] sm:$0xff]  ;;  %s1045_s14 = sshll.u32 %s1042_s16, 4  ;;  %s1031_s22 = scalar_lea.sflag [#allocation4], %s1840_s11  ;;  %s1046_s14 = int_to_ptr.hbm [resolvable:$true] %s1045_s14 }
  0x4c   : > { %v483_v10 = vld [vmem:[#allocation5 + $0xa0] sm:$0xff]  ;;  %v477_v12 = vld [vmem:[#allocation5 + $0x70] sm:$0xff]  ;;  %v462_v13 = vld [vmem:[%s1846_s26 + $0x8] sm:$0xff]  ;;  %s1577_s19 = sshra.s32 %s1046_s14, 4  ;;  %s1583_s3 = scalar_lea.hbm %s2086_s8, 32  ;;  %s1578_s19 = int_to_ptr.hbm [resolvable:$true] %s1577_s19 }
  0x4d   : > { %504 = vmatpush.msra.mxu2 %v478_v2  ;;  %v474_v14 = vld [vmem:[#allocation5 + $0x58] sm:$0xff]  ;;  %v471_v15 = vld [vmem:[#allocation5 + $0x40] sm:$0xff]  ;;  %v468_v16 = vld [vmem:[#allocation5 + $0x28] sm:$0xff]  ;;  %s1579_s24 = scalar_lea.hbm %s1578_s19, 16  ;;  %p1584_p12 = scmp.lt.s32.totalorder %s1578_s19, %s2086_s8 }
  0x4e   : > { %v465_v17 = vld [vmem:[#allocation5 + $0x10] sm:$0xff]  ;;  %v482_v19 = vld [vmem:[#allocation5 + $0x98] sm:$0xff]  ;;  %v479_v20 = vld [vmem:[#allocation5 + $0x80] sm:$0xff]  ;;  %p1580_p1 = scmp.ne.s32.totalorder %s1578_s19, %s1579_s24  ;;  %p1585_p7 = scmp.lt.s32.totalorder %s1583_s3, %s1579_s24 }
  0x4f   : > { %505 = vmatpush.msra.mxu2 %v475_v3  ;;  %v485_v18 = vld [vmem:[#allocation5 + $0xb0] sm:$0xff]  ;;  %v476_v21 = vld [vmem:[#allocation5 + $0x68] sm:$0xff]  ;;  %v470_v24 = vld [vmem:[#allocation5 + $0x38] sm:$0xff] }
  0x50   : > { %525 = vmatpush.msra.mxu1 %v485_v18  ;;  %v473_v22 = vld [vmem:[#allocation5 + $0x50] sm:$0xff]  ;;  %v467_v25 = vld [vmem:[#allocation5 + $0x20] sm:$0xff]  ;;  %v464_v26 = vld [vmem:[#allocation5 + $0x8] sm:$0xff]  ;;  %p1581_p3 = pnand %p1580_p1, %p1806_p4  ;;  %p1586_p8 = por %p1585_p7, %p1584_p12 }
  0x51   : > { %506 = vmatpush.msra.mxu2 %v472_v4  ;;  %v1872_v30 = vld [vmem:[#allocation10] sm:$0xff]  ;;  %v1876_v31 = vld [vmem:[#allocation10 + $0x8] sm:$0xff]  ;;  %v1885_v34 = vld [vmem:[#allocation11 + $0x68] sm:$0xff] }
  0x52   : > { %526 = vmatpush.msra.mxu1 %v482_v19  ;;  %v1880_v32 = vld [vmem:[#allocation11 + $0x78] sm:$0xff]  ;;  %v1882_v33 = vld [vmem:[#allocation11 + $0x70] sm:$0xff]  ;;  %v1888_v35 = vld [vmem:[#allocation11 + $0x60] sm:$0xff]  ;;  %p1582_p5 = pneg %p1581_p3 }
  0x53   : > { %507 = vmatpush.msra.mxu2 %v469_v5  ;;  %623 = vmatpush.msra.mxu0 %v1880_v32  ;;  %v1891_v37 = vld [vmem:[#allocation11 + $0x58] sm:$0xff]  ;;  %v1894_v38 = vld [vmem:[#allocation11 + $0x50] sm:$0xff]  ;;  %v1897_v40 = vld [vmem:[#allocation11 + $0x48] sm:$0xff] }
  0x54   : > { %527 = vmatpush.msra.mxu1 %v479_v20  ;;  %v1900_v41 = vld [vmem:[#allocation11 + $0x40] sm:$0xff]  ;;  %v1903_v42 = vld [vmem:[#allocation8] sm:$0x3f]  ;;  %v1905_v43 = vld [vmem:[#allocation11 + $0x38] sm:$0xff]  ;;  %p1587_p9 = pnand %p1586_p8, %p1582_p5 }
  0x55   : > { %508 = vmatpush.msra.mxu2 %v466_v6  ;;  %624 = vmatpush.msra.mxu0 %v1882_v33  ;;  %v1908_v45 = vld [vmem:[#allocation11 + $0x30] sm:$0xff]  ;;  %v595_v47 = vperm.slane %v1903_v42, 0  ;;  %v1912_v49 = vld [vmem:[#allocation11 + $0x28] sm:$0xff]  ;;  %v1915_v51 = vld [vmem:[#allocation11 + $0x20] sm:$0xff] }
  0x56   : > { %528 = vmatpush.msra.mxu1 %v476_v21  ;;  %v1922_v54 = vld [vmem:[#allocation11 + $0x18] sm:$0xff]  ;;  %v1927_v56 = vld [vmem:[#allocation11 + $0x10] sm:$0xff]  ;;  %v1932_v58 = vld [vmem:[#allocation11 + $0x8] sm:$0xff] }
  0x57   : > { %509 = vmatpush.msra.mxu2 %v463_v7  ;;  %625 = vmatpush.msra.mxu0 %v1885_v34  ;;  %v1939_v59 = vld [vmem:[%s2083_s5] sm:$0x3]  ;;  %v1945_v60 = vld [vmem:[#allocation11] sm:$0xff]  ;;  %v1948_v62 = vld [vmem:[#allocation13 + $0x78] sm:$0xff] }
  0x58   : > { %1197 = vmatmul.msk.f32.vlgmr.msra.gmra.mxu2 %vm487_vm0, %v461_v8  ;;  %529 = vmatpush.msra.mxu1 %v473_v22  ;;  %v1951_v63 = vld [vmem:[#allocation13 + $0x70] sm:$0xff]  ;;  %v1954_v0 = vld [vmem:[#allocation13 + $0x68] sm:$0xff]  ;;  %v1957_v1 = vld [vmem:[#allocation13 + $0x60] sm:$0xff] }
  0x59   : > { %548 = vmatpush.msrb.mxu2 %v486_v9  ;;  %626 = vmatpush.msra.mxu0 %v1888_v35  ;;  %v1960_v2 = vld [vmem:[#allocation13 + $0x58] sm:$0xff]  ;;  %v1963_v3 = vld [vmem:[#allocation13 + $0x50] sm:$0xff]  ;;  %v1966_v4 = vld [vmem:[#allocation13 + $0x48] sm:$0xff] }
  0x5a   : > { %530 = vmatpush.msra.mxu1 %v470_v24  ;;  %v1969_v5 = vld [vmem:[#allocation13 + $0x40] sm:$0xff]  ;;  %v1972_v6 = vld [vmem:[#allocation13 + $0x38] sm:$0xff]  ;;  %v1975_v7 = vld [vmem:[#allocation13 + $0x30] sm:$0xff] }
  0x5b   : > { %549 = vmatpush.msrb.mxu2 %v483_v10  ;;  %627 = vmatpush.msra.mxu0 %v1891_v37  ;;  %v1981_v9 = vld [vmem:[#allocation13 + $0x20] sm:$0xff]  ;;  %v1984_v10 = vld [vmem:[#allocation13 + $0x18] sm:$0xff] }
  0x5c   : > { %531 = vmatpush.msra.mxu1 %v467_v25 }
  0x5d   : > { %550 = vmatpush.msrb.mxu2 %v480_v11  ;;  %628 = vmatpush.msra.mxu0 %v1894_v38  ;;  %v1987_v11 = vld [vmem:[#allocation13 + $0x10] sm:$0xff] }
  0x5e   : > { %532 = vmatpush.msra.mxu1 %v464_v26 }
  0x5f   : > { %551 = vmatpush.msrb.mxu2 %v477_v12  ;;  %1199 = vmatmul.msk.f32.vlgmr.msra.gmra.mxu1 %vm487_vm0, %v461_v8 }
  0x60   : > { %1198 = vmatmul.msk.f32.gmra.mxu2 %vm487_vm0, %v462_v13  ;;  %629 = vmatpush.msra.mxu0 %v1897_v40 }
  0x61   : > { %552 = vmatpush.msrb.mxu2 %v474_v14  ;;  %670 = vmatpush.msrb.mxu1 %v1948_v62 }
  0x62   : > { %630 = vmatpush.msra.mxu0 %v1900_v41 }
  0x63   : > { %553 = vmatpush.msrb.mxu2 %v471_v15  ;;  %671 = vmatpush.msrb.mxu1 %v1951_v63  ;;  %v1993_v15 = vld [vmem:[#allocation13] sm:$0xff] }
  0x64   : > { %631 = vmatpush.msra.mxu0 %v1905_v43 }
  0x65   : > { %554 = vmatpush.msrb.mxu2 %v468_v16  ;;  %672 = vmatpush.msrb.mxu1 %v1954_v0 }
  0x66   : > { %632 = vmatpush.msra.mxu0 %v1908_v45 }
  0x67   : > { %555 = vmatpush.msrb.mxu2 %v465_v17  ;;  %1200 = vmatmul.msk.f32.gmra.mxu1 %vm487_vm0, %v462_v13 }
  0x68   : > { %1201 = vmatmul.msk.f32.vlgmr.msrb.gmra.mxu2 %vm487_vm0, %v461_v8  ;;  %633 = vmatpush.msra.mxu0 %v1912_v49  ;;  %v1978_v8 = vld [vmem:[#allocation13 + $0x28] sm:$0xff] }
  0x69   : > { %673 = vmatpush.msrb.mxu1 %v1957_v1 }
  0x6a   : > { %634 = vmatpush.msra.mxu0 %v1915_v51 }
  0x6b   : > { %674 = vmatpush.msrb.mxu1 %v1960_v2 }
  0x6c   : > { %635 = vmatpush.msra.mxu0 %v1922_v54 }
  0x6d   : > { %675 = vmatpush.msrb.mxu1 %v1963_v3 }
  0x6e   : > { %636 = vmatpush.msra.mxu0 %v1927_v56 }
  0x6f   : > { %676 = vmatpush.msrb.mxu1 %v1966_v4 }
  0x70   : > { %1202 = vmatmul.msk.f32.gmra.mxu2 %vm487_vm0, %v462_v13  ;;  %637 = vmatpush.msra.mxu0 %v1932_v58  ;;  %v1990_v13 = vld [vmem:[#allocation13 + $0x8] sm:$0xff] }
  0x71   : > { %677 = vmatpush.msrb.mxu1 %v1969_v5 }
  0x72   : > { %638 = vmatpush.msra.mxu0 %v1945_v60 }
  0x73   : > { %678 = vmatpush.msrb.mxu1 %v1972_v6 }
  0x75   : > { %679 = vmatpush.msrb.mxu1 %v1975_v7 }
  0x77   : > { %680 = vmatpush.msrb.mxu1 %v1978_v8 }
  0x79   : > { %681 = vmatpush.msrb.mxu1 %v1981_v9 }
  0x7b   : > { %682 = vmatpush.msrb.mxu1 %v1984_v10 }
  0x7d   : > { %683 = vmatpush.msrb.mxu1 %v1987_v11 }
  0x7f   : > { %684 = vmatpush.msrb.mxu1 %v1990_v13 }
  0x81   : > { %685 = vmatpush.msrb.mxu1 %v1993_v15 }
  0xdb   : > { %v511_v23 = vpop.f32.mrf.mxu2 }
  0xdc   : > { %v534_v36 = vpop.f32.mrf.mxu1 }
  0xe3   : > { %v514_v27 = vpop.f32.mrf.mxu2 }
  0xe4   : > { %v537_v44 = vpop.f32.mrf.mxu1 }
  0xeb   : > { %v557_v28 = vpop.f32.mrf.mxu2 }
  0xf3   : > { %v560_v29 = vpop.f32.mrf.mxu2 }
  0xf4   : > { %582 = vmatpush.msra.mxu3 %v560_v29 }
  0xf6   : > { %583 = vmatpush.msra.mxu3 %v557_v28 }
  0xf8   : > { %584 = vmatpush.msra.mxu3 %v514_v27 }
  0xfa   : > { %585 = vmatpush.msra.mxu3 %v511_v23 }
  0xfb   : > { %1203 = vmatmul.msk.f32.vlgmr.msra.gmra.mxu3 %vm563_vm1, %v1872_v30 }
 0x103   : > { %1204 = vmatmul.msk.f32.gmra.mxu3 %vm563_vm1, %v1876_v31 }
 0x17e   : > { %v587_v39 = vpop.f32.mrf.mxu3 }
 0x17f   : > { %v593_v46 = vadd.f32 %v587_v39, %v534_v36 }
 0x181   : > { %v1917_v52 = vadd.f32 %v595_v47, %v593_v46  ;;  %v788_v46 = vld [vmem:[#allocation7 + $0x170] sm:$0xff] }
 0x183   : > { %v598_v57 = vmul.f32 %v1917_v52, %v1917_v52 }
 0x186   : > { %v590_v48 = vpop.f32.mrf.mxu3 }
 0x187   : > { %v594_v50 = vadd.f32 %v590_v48, %v537_v44  ;;  %v787_v44 = vld [vmem:[#allocation7 + $0x168] sm:$0xff]  ;;  %v784_v48 = vld [vmem:[#allocation7 + $0x150] sm:$0xff] }
 0x188   : > { %790 = vmatpush.msra.mxu2 %v787_v44  ;;  %v765_v44 = vld [vmem:[#allocation7 + $0xb8] sm:$0xff] }
 0x189   : > { %v1919_v53 = vadd.f32 %v595_v47, %v594_v50  ;;  %v789_v47 = vld [vmem:[#allocation7 + $0x178] sm:$0xff] }
 0x18a   : > { %836 = vmatpush.msrb.mxu0 %v789_v47  ;;  %v785_v50 = vld [vmem:[#allocation7 + $0x158] sm:$0xff]  ;;  %791 = vmatpush.msra.mxu2 %v784_v48  ;;  %v762_v48 = vld [vmem:[#allocation7 + $0xa0] sm:$0xff] }
 0x18b   : > { %v599_v55 = vmul.f32 %v1919_v53, %v1919_v53  ;;  %v761_v47 = vld [vmem:[#allocation7 + $0x98] sm:$0xff] }
 0x18d   : > { %615 = vmatpush.msrb.mxu3 %v599_v55  ;;  %v786_v55 = vld [vmem:[#allocation7 + $0x160] sm:$0xff] }
 0x18e   : > { %837 = vmatpush.msrb.mxu0 %v786_v55  ;;  %v758_v55 = vld [vmem:[#allocation7 + $0x80] sm:$0xff] }
 0x18f   : > { %616 = vmatpush.msrb.mxu3 %v598_v57  ;;  %v781_v57 = vld [vmem:[#allocation7 + $0x138] sm:$0xff] }
 0x190   : > { %792 = vmatpush.msra.mxu2 %v781_v57  ;;  %v759_v57 = vld [vmem:[#allocation7 + $0x88] sm:$0xff] }
 0x191   : > { %617 = vmatpush.msrb.mxu3 %v1919_v53 }
 0x193   : > { %618 = vmatpush.msrb.mxu3 %v1917_v52 }
 0x194   : > { %1205 = vmatmul.msk.f32.vlgmr.msrb.gmra.mxu3 %vm563_vm1, %v1939_v59 }
 0x195   : > { %813 = vmatpush.msra.mxu3 %v788_v46  ;;  %v760_v46 = vld [vmem:[#allocation7 + $0x90] sm:$0xff] }
 0x197   : > { %814 = vmatpush.msra.mxu3 %v785_v50  ;;  %v757_v50 = vld [vmem:[#allocation7 + $0x78] sm:$0xff] }
 0x217   : > { %v620_v61 = vpop.f32.mrf.mxu3 }
 0x218   : > { %639 = vmatmul.f32.vlgmr.msra.gmra.mxu0 %v620_v61  ;;  %v782_v61 = vld [vmem:[#allocation7 + $0x140] sm:$0xff] }
 0x219   : > { %815 = vmatpush.msra.mxu3 %v782_v61  ;;  %v754_v61 = vld [vmem:[#allocation7 + $0x60] sm:$0xff] }
 0x295   : > { %v640_v12 = vpop.f32.mrf.mxu0 }
 0x296   : > { %v643_v14 = vmul.f32 %v640_v12, %v640_v12  ;;  %v660_v27 = vsub.f32 0.0, %v640_v12 }
 0x298   : > { %v645_v16 = vrot.slane %v643_v14, 7  ;;  %v778_v14 = vld [vmem:[#allocation7 + $0x120] sm:$0xff] }
 0x299   : > { %793 = vmatpush.msra.mxu2 %v778_v14  ;;  %v756_v14 = vld [vmem:[#allocation7 + $0x70] sm:$0xff] }
 0x29a   : > { %v647_v17 = vsub.f32 %v640_v12, %v645_v16  ;;  %v783_v12 = vld [vmem:[#allocation7 + $0x148] sm:$0xff] }
 0x29b   : > { %838 = vmatpush.msrb.mxu0 %v783_v12  ;;  %v779_v16 = vld [vmem:[#allocation7 + $0x128] sm:$0xff] }
 0x29c   : > { %v648_v18 = vmax.f32 %v647_v17, 0.0  ;;  %v780_v17 = vld [vmem:[#allocation7 + $0x130] sm:$0xff]  ;;  %816 = vmatpush.msra.mxu3 %v779_v16  ;;  %v755_v12 = vld [vmem:[#allocation7 + $0x68] sm:$0xff]  ;;  %v691_v16 = vrot.slane %v1903_v42, 1 }
 0x29d   : > { %839 = vmatpush.msrb.mxu0 %v780_v17  ;;  %v751_v17 = vld [vmem:[#allocation7 + $0x48] sm:$0xff] }
 0x29e   : > { %v649_v19 = vadd.f32 1e-05, %v648_v18  ;;  %v775_v18 = vld [vmem:[#allocation7 + $0x108] sm:$0xff] }
 0x29f   : > { %794 = vmatpush.msra.mxu2 %v775_v18  ;;  %v752_v18 = vld [vmem:[#allocation7 + $0x50] sm:$0xff] }
 0x2a0   : > { %1333 = vrsqrt.f32 %v649_v19  ;;  %vm656_vm3 = vweird.f32 %v649_v19 }
 0x2a6   : > { %v1334_v20 = vpop.eup %1333 }
 0x2a7   : > { %v651_v21 = vmul.f32 %v1334_v20, %v649_v19  ;;  %vm657_vm2 = vweird.f32 %v1334_v20  ;;  %v776_v19 = vld [vmem:[#allocation7 + $0x110] sm:$0xff] }
 0x2a8   : > { %vm658_vm4 = vmor %vm656_vm3, %vm657_vm2  ;;  %817 = vmatpush.msra.mxu3 %v776_v19  ;;  %v753_v19 = vld [vmem:[#allocation7 + $0x58] sm:$0xff] }
 0x2a9   : > { %v652_v22 = vmul.f32 %v1334_v20, %v651_v21  ;;  %v772_v21 = vld [vmem:[#allocation7 + $0xf0] sm:$0xff] }
 0x2aa   : > { %795 = vmatpush.msra.mxu2 %v772_v21  ;;  %v749_v21 = vld [vmem:[#allocation7 + $0x38] sm:$0xff] }
 0x2ab   : > { %v653_v23 = vmul.f32 0.5, %v652_v22  ;;  %v773_v22 = vld [vmem:[#allocation7 + $0xf8] sm:$0xff] }
 0x2ac   : > { %818 = vmatpush.msra.mxu3 %v773_v22 }
 0x2ad   : > { %v654_v24 = vsub.f32 1.5, %v653_v23  ;;  %v774_v23 = vld [vmem:[#allocation7 + $0x100] sm:$0xff] }
 0x2af   : > { %v655_v25 = vmul.f32 %v1334_v20, %v654_v24  ;;  %v769_v24 = vld [vmem:[#allocation7 + $0xd8] sm:$0xff] }
 0x2b0   : > { %796 = vmatpush.msra.mxu2 %v769_v24 }
 0x2b1   : > { %v659_v26 = vsel %vm658_vm4, %v1334_v20, %v655_v25  ;;  %v777_v20 = vld [vmem:[#allocation7 + $0x118] sm:$0xff]  ;;  %v770_v25 = vld [vmem:[#allocation7 + $0xe0] sm:$0xff] }
 0x2b2   : > { %v662_v28 = vrot.slane %v659_v26, 1  ;;  %840 = vmatpush.msrb.mxu0 %v777_v20  ;;  %v771_v26 = vld [vmem:[#allocation7 + $0xe8] sm:$0xff]  ;;  %819 = vmatpush.msra.mxu3 %v770_v25  ;;  %v748_v20 = vld [vmem:[#allocation7 + $0x30] sm:$0xff] }
 0x2b4   : > { %v664_v29 = vmul.f32 %v662_v28, %v660_v27  ;;  %841 = vmatpush.msrb.mxu0 %v774_v23  ;;  %v766_v27 = vld [vmem:[#allocation7 + $0xc0] sm:$0xff] }
 0x2b5   : > { %797 = vmatpush.msra.mxu2 %v766_v27  ;;  %v750_v23 = vld [vmem:[#allocation7 + $0x40] sm:$0xff] }
 0x2b6   : > { %v666_v36 = vrot.slane %v664_v29, 7  ;;  %v768_v29 = vld [vmem:[#allocation7 + $0xd0] sm:$0xff]  ;;  %842 = vmatpush.msrb.mxu0 %v771_v26  ;;  %v745_v26 = vld [vmem:[#allocation7 + $0x18] sm:$0xff]  ;;  %v746_v27 = vld [vmem:[#allocation7 + $0x20] sm:$0xff] }
 0x2b8   : > { %v669_v39 = vsel %vm668_vm5, %v662_v28, %v666_v36  ;;  %v767_v28 = vld [vmem:[#allocation7 + $0xc8] sm:$0xff]  ;;  %843 = vmatpush.msrb.mxu0 %v768_v29 }
 0x2b9   : > { %686 = vmatmul.f32.vlgmr.msrb.gmra.mxu1 %v669_v39  ;;  %v763_v36 = vld [vmem:[#allocation7 + $0xa8] sm:$0xff]  ;;  %v764_v39 = vld [vmem:[#allocation7 + $0xb0] sm:$0xff]  ;;  %820 = vmatpush.msra.mxu3 %v767_v28 }
 0x2ba   : > { %798 = vmatpush.msra.mxu2 %v763_v36  ;;  %844 = vmatpush.msrb.mxu0 %v765_v44  ;;  %v747_v28 = vld [vmem:[#allocation7 + $0x28] sm:$0xff] }
 0x2bb   : > { %821 = vmatpush.msra.mxu3 %v764_v39  ;;  %v742_v39 = vld [vmem:[#allocation7] sm:$0xff]  ;;  %v743_v44 = vld [vmem:[#allocation7 + $0x8] sm:$0xff] }
 0x2bc   : > { %799 = vmatpush.msra.mxu2 %v760_v46  ;;  %845 = vmatpush.msrb.mxu0 %v762_v48  ;;  %v744_v46 = vld [vmem:[#allocation7 + $0x10] sm:$0xff] }
 0x2bd   : > { %822 = vmatpush.msra.mxu3 %v761_v47 }
 0x2be   : > { %800 = vmatpush.msra.mxu2 %v757_v50  ;;  %846 = vmatpush.msrb.mxu0 %v759_v57 }
 0x2bf   : > { %823 = vmatpush.msra.mxu3 %v758_v55 }
 0x2c0   : > { %801 = vmatpush.msra.mxu2 %v754_v61  ;;  %847 = vmatpush.msrb.mxu0 %v756_v14 }
 0x2c1   : > { %824 = vmatpush.msra.mxu3 %v755_v12 }
 0x2c2   : > { %802 = vmatpush.msra.mxu2 %v751_v17  ;;  %848 = vmatpush.msrb.mxu0 %v753_v19 }
 0x2c3   : > { %825 = vmatpush.msra.mxu3 %v752_v18 }
 0x2c4   : > { %803 = vmatpush.msra.mxu2 %v748_v20  ;;  %849 = vmatpush.msrb.mxu0 %v750_v23 }
 0x2c5   : > { %826 = vmatpush.msra.mxu3 %v749_v21 }
 0x2c6   : > { %804 = vmatpush.msra.mxu2 %v745_v26  ;;  %850 = vmatpush.msrb.mxu0 %v747_v28 }
 0x2c7   : > { %827 = vmatpush.msra.mxu3 %v746_v27 }
 0x2c8   : > { %805 = vmatpush.msra.mxu2 %v742_v39  ;;  %851 = vmatpush.msrb.mxu0 %v744_v46 }
 0x2c9   : > { %828 = vmatpush.msra.mxu3 %v743_v44 }
 0x2cb   : > { %955 = vmatpush.msrb.mxu3 %v1948_v62 }
 0x2cd   : > { %956 = vmatpush.msrb.mxu3 %v1951_v63 }
 0x2cf   : > { %957 = vmatpush.msrb.mxu3 %v1954_v0 }
 0x2d1   : > { %958 = vmatpush.msrb.mxu3 %v1957_v1 }
 0x2d3   : > { %959 = vmatpush.msrb.mxu3 %v1960_v2 }
 0x2d5   : > { %960 = vmatpush.msrb.mxu3 %v1963_v3 }
 0x2d7   : > { %961 = vmatpush.msrb.mxu3 %v1966_v4 }
 0x2d9   : > { %962 = vmatpush.msrb.mxu3 %v1969_v5 }
 0x2db   : > { %963 = vmatpush.msrb.mxu3 %v1972_v6 }
 0x2dd   : > { %964 = vmatpush.msrb.mxu3 %v1975_v7 }
 0x2df   : > { %965 = vmatpush.msrb.mxu3 %v1978_v8 }
 0x2e1   : > { %966 = vmatpush.msrb.mxu3 %v1981_v9 }
 0x2e3   : > { %967 = vmatpush.msrb.mxu3 %v1984_v10 }
 0x2e5   : > { %968 = vmatpush.msrb.mxu3 %v1987_v11 }
 0x2e7   : > { %969 = vmatpush.msrb.mxu3 %v1990_v13 }
 0x2e9   : > { %970 = vmatpush.msrb.mxu3 %v1993_v15 }
 0x336   : > { %v687_v22 = vpop.f32.mrf.mxu1 }
 0x337   : > { %v693_v24 = vmul.f32 %v691_v16, %v687_v22  ;;  %v694_v25 = vmul.f32 %v687_v22, %v1903_v42 }
 0x339   : > { %v695_v29 = vadd.f32 %v694_v25, %v691_v16  ;;  %v696_v36 = vperm.slane %v693_v24, 0 }
 0x33b   : > { %v697_v47 = vmul.f32 %v696_v36, %v1917_v52  ;;  %v698_v48 = vmul.f32 %v696_v36, %v1919_v53  ;;  %v699_v50 = vperm.slane %v695_v29, 1 }
 0x33d   : > { %v700_v55 = vadd.f32 %v699_v50, %v697_v47  ;;  %v701_v57 = vadd.f32 %v699_v50, %v698_v48 }
 0x33f   : > { %v1206_v61 = vmul.f32 -1.442695, %v700_v55  ;;  %v1207_v12 = vmul.f32 -1.442695, %v701_v57 }
 0x341   : > { %1335 = vpow2.f32 %v1206_v61  ;;  %v978_v61 = vrot.slane %v1903_v42, 3 }
 0x342   : > { %1337 = vpow2.f32 %v1207_v12 }
 0x347   : > { %v1336_v52 = vpop.eup %1335 }
 0x348   : > { %v1338_v53 = vpop.eup %1337  ;;  %v708_v14 = vadd.f32 1.0, %v1336_v52 }
 0x349   : > { %v709_v16 = vadd.f32 1.0, %v1338_v53 }
 0x34a   : > { %1339 = vrcp.f32 %v708_v14  ;;  %v721_v3 = vand.u32 2147483648, %v708_v14  ;;  %v719_v18 = vand.u32 2147483647, %v708_v14  ;;  %vm715_vm7 = vweird.f32 %v708_v14 }
 0x34b   : > { %1341 = vrcp.f32 %v709_v16  ;;  %v736_v20 = vand.u32 2147483648, %v709_v16  ;;  %vm730_vm11 = vweird.f32 %v709_v16  ;;  %v734_v22 = vand.u32 2147483647, %v709_v16 }
 0x34c   : > { %v722_v7 = vor.u32 1.1754944e-38, %v721_v3  ;;  %vm720_vm9 = vcmp.eq.f32.partialorder %v719_v18, 8.507059e+37 }
 0x34d   : > { %v737_v11 = vor.u32 1.1754944e-38, %v736_v20  ;;  %vm735_vm13 = vcmp.eq.f32.partialorder %v734_v22, 8.507059e+37 }
 0x350   : > { %v1340_v62 = vpop.eup %1339 }
 0x351   : > { %v1342_v63 = vpop.eup %1341  ;;  %v711_v0 = vmul.f32 %v1340_v62, %v708_v14  ;;  %vm716_vm6 = vweird.f32 %v1340_v62 }
 0x352   : > { %v726_v1 = vmul.f32 %v1342_v63, %v709_v16  ;;  %vm717_vm8 = vmor %vm715_vm7, %vm716_vm6  ;;  %vm731_vm10 = vweird.f32 %v1342_v63 }
 0x353   : > { %v712_v2 = vsub.f32 1.0, %v711_v0  ;;  %vm732_vm12 = vmor %vm730_vm11, %vm731_vm10 }
 0x354   : > { %v727_v17 = vsub.f32 1.0, %v726_v1 }
 0x355   : > { %v713_v4 = vmul.f32 %v1340_v62, %v712_v2 }
 0x356   : > { %v728_v5 = vmul.f32 %v1342_v63, %v727_v17 }
 0x357   : > { %v714_v6 = vadd.f32 %v1340_v62, %v713_v4 }
 0x358   : > { %v729_v8 = vadd.f32 %v1342_v63, %v728_v5 }
 0x359   : > { %v718_v19 = vsel %vm717_vm8, %v1340_v62, %v714_v6 }
 0x35a   : > { %v723_v9 = vsel %vm720_vm9, %v722_v7, %v718_v19  ;;  %v733_v10 = vsel %vm732_vm12, %v1342_v63, %v729_v8 }
 0x35b   : > { %v740_v21 = vmul.f32 %v723_v9, %v700_v55  ;;  %v738_v23 = vsel %vm735_vm13, %v737_v11, %v733_v10 }
 0x35c   : > { %v741_v24 = vmul.f32 %v738_v23, %v701_v57  ;;  %v975_v57 = vrot.slane %v1903_v42, 4 }
 0x35d   : > { %806 = vmatmul.f32.vlgmr.msra.gmra.mxu2 %v740_v21  ;;  %829 = vmatmul.f32.vlgmr.msra.gmra.mxu3 %v740_v21 }
 0x35e   : > { %852 = vmatmul.f32.vlgmr.msrb.gmra.mxu0 %v740_v21 }
 0x365   : > { %809 = vmatmul.f32.gmra.mxu2 %v741_v24  ;;  %832 = vmatmul.f32.gmra.mxu3 %v741_v24 }
 0x366   : > { %855 = vmatmul.f32.gmra.mxu0 %v741_v24 }
 0x3db   : > { %v853_v13 = vpop.f32.mrf.mxu0 }
 0x3e0   : > { %v807_v25 = vpop.f32.mrf.mxu2 }
 0x3e3   : > { %v856_v26 = vpop.f32.mrf.mxu0 }
 0x3e4   : > { %871 = vmatpush.msra.mxu1 %v856_v26 }
 0x3e6   : > { %872 = vmatpush.msra.mxu1 %v853_v13 }
 0x3e8   : > { %v810_v27 = vpop.f32.mrf.mxu2 }
 0x3e9   : > { %873 = vmatpush.msra.mxu1 %v810_v27 }
 0x3eb   : > { %874 = vmatpush.msra.mxu1 %v807_v25 }
 0x3ec   : > { %1208 = vmatmul.msk.f32.vlgmr.msra.gmra.mxu1 %vm563_vm1, %v1872_v30  ;;  %v830_v30 = vpop.f32.mrf.mxu3 }
 0x3ed   : > { %909 = vmatpush.msrb.mxu1 %v1880_v32 }
 0x3ef   : > { %910 = vmatpush.msrb.mxu1 %v1882_v33  ;;  %v884_v33 = vperm.slane %v1903_v42, 3 }
 0x3f1   : > { %911 = vmatpush.msrb.mxu1 %v1885_v34 }
 0x3f3   : > { %912 = vmatpush.msrb.mxu1 %v1888_v35 }
 0x3f4   : > { %1209 = vmatmul.msk.f32.gmra.mxu1 %vm563_vm1, %v1876_v31  ;;  %v833_v34 = vpop.f32.mrf.mxu3 }
 0x3f5   : > { %913 = vmatpush.msrb.mxu1 %v1891_v37 }
 0x3f7   : > { %914 = vmatpush.msrb.mxu1 %v1894_v38 }
 0x3f9   : > { %915 = vmatpush.msrb.mxu1 %v1897_v40 }
 0x3fb   : > { %916 = vmatpush.msrb.mxu1 %v1900_v41 }
 0x3fd   : > { %917 = vmatpush.msrb.mxu1 %v1905_v43 }
 0x3ff   : > { %918 = vmatpush.msrb.mxu1 %v1908_v45 }
 0x401   : > { %919 = vmatpush.msrb.mxu1 %v1912_v49 }
 0x403   : > { %920 = vmatpush.msrb.mxu1 %v1915_v51 }
 0x405   : > { %921 = vmatpush.msrb.mxu1 %v1922_v54 }
 0x407   : > { %922 = vmatpush.msrb.mxu1 %v1927_v56 }
 0x409   : > { %923 = vmatpush.msrb.mxu1 %v1932_v58 }
 0x40b   : > { %924 = vmatpush.msrb.mxu1 %v1945_v60 }
 0x469   : > { %v876_v31 = vpop.f32.mrf.mxu1 }
 0x46a   : > { %v882_v32 = vadd.f32 %v876_v31, %v830_v30 }
 0x46c   : > { %v885_v38 = vadd.f32 %v884_v33, %v882_v32 }
 0x46e   : > { %v887_v43 = vmul.f32 %v885_v38, %v885_v38 }
 0x471   : > { %v879_v35 = vpop.f32.mrf.mxu1 }
 0x472   : > { %v883_v37 = vadd.f32 %v879_v35, %v833_v34 }
 0x474   : > { %v886_v40 = vadd.f32 %v884_v33, %v883_v37 }
 0x476   : > { %v888_v41 = vmul.f32 %v886_v40, %v886_v40 }
 0x478   : > { %901 = vmatpush.msrb.mxu2 %v888_v41 }
 0x47a   : > { %902 = vmatpush.msrb.mxu2 %v887_v43 }
 0x47c   : > { %903 = vmatpush.msrb.mxu2 %v886_v40 }
 0x47e   : > { %904 = vmatpush.msrb.mxu2 %v885_v38 }
 0x47f   : > { %1210 = vmatmul.msk.f32.vlgmr.msrb.gmra.mxu2 %vm563_vm1, %v1939_v59 }
 0x502   : > { %v906_v45 = vpop.f32.mrf.mxu2 }
 0x503   : > { %925 = vmatmul.f32.vlgmr.msrb.gmra.mxu1 %v906_v45 }
 0x580   : > { %v926_v49 = vpop.f32.mrf.mxu1 }
 0x581   : > { %v929_v51 = vmul.f32 %v926_v49, %v926_v49  ;;  %v946_v59 = vsub.f32 0.0, %v926_v49 }
 0x583   : > { %v931_v54 = vrot.slane %v929_v51, 7 }
 0x585   : > { %v933_v56 = vsub.f32 %v926_v49, %v931_v54 }
 0x587   : > { %v934_v58 = vmax.f32 %v933_v56, 0.0 }
 0x589   : > { %v935_v60 = vadd.f32 1e-05, %v934_v58 }
 0x58b   : > { %1343 = vrsqrt.f32 %v935_v60  ;;  %vm942_vm15 = vweird.f32 %v935_v60 }
 0x591   : > { %v1344_v15 = vpop.eup %1343 }
 0x592   : > { %v937_v28 = vmul.f32 %v1344_v15, %v935_v60  ;;  %vm943_vm14 = vweird.f32 %v1344_v15 }
 0x593   : > { %vm944_vm0 = vmor %vm942_vm15, %vm943_vm14 }
 0x594   : > { %v938_v29 = vmul.f32 %v1344_v15, %v937_v28 }
 0x596   : > { %v939_v36 = vmul.f32 0.5, %v938_v29 }
 0x598   : > { %v940_v39 = vsub.f32 1.5, %v939_v36 }
 0x59a   : > { %v941_v44 = vmul.f32 %v1344_v15, %v940_v39 }
 0x59c   : > { %v945_v46 = vsel %vm944_vm0, %v1344_v15, %v941_v44 }
 0x59d   : > { %v948_v47 = vrot.slane %v945_v46, 1 }
 0x59f   : > { %v950_v48 = vmul.f32 %v948_v47, %v946_v59 }
 0x5a1   : > { %v952_v50 = vrot.slane %v950_v48, 7 }
 0x5a3   : > { %v954_v55 = vsel %vm668_vm5, %v948_v47, %v952_v50 }
 0x5a4   : > { %971 = vmatmul.f32.vlgmr.msrb.gmra.mxu3 %v954_v55 }
 0x627   : > { %v972_v12 = vpop.f32.mrf.mxu3 }
 0x628   : > { %v977_v52 = vmul.f32 %v975_v57, %v972_v12  ;;  %v980_v53 = vmul.f32 %v978_v61, %v972_v12 }
 0x62a   : > { %v981_v14 = vadd.f32 %v980_v53, %v975_v57  ;;  %v982_v16 = vperm.slane %v977_v52, 0 }
 0x62c   : > { %v983_v62 = vmul.f32 %v982_v16, %v885_v38  ;;  %v984_v63 = vmul.f32 %v982_v16, %v886_v40  ;;  %v985_v0 = vperm.slane %v981_v14, 1 }
 0x62e   : > { %v986_v1 = vadd.f32 %v985_v0, %v983_v62  ;;  %v987_v2 = vadd.f32 %v985_v0, %v984_v63 }
 0x630   : > { %v1211_v3 = vmul.f32 -1.442695, %v986_v1  ;;  %v1212_v17 = vmul.f32 -1.442695, %v987_v2 }
 0x632   : > { %1345 = vpow2.f32 %v1211_v3 }
 0x633   : > { %1347 = vpow2.f32 %v1212_v17 }
 0x638   : > { %v1346_v4 = vpop.eup %1345 }
 0x639   : > { %v1348_v18 = vpop.eup %1347  ;;  %v994_v5 = vadd.f32 1.0, %v1346_v4 }
 0x63a   : > { %v995_v6 = vadd.f32 1.0, %v1348_v18 }
 0x63b   : > { %1349 = vrcp.f32 %v994_v5  ;;  %v1007_v20 = vand.u32 2147483648, %v994_v5  ;;  %v1005_v10 = vand.u32 2147483647, %v994_v5  ;;  %vm1001_vm3 = vweird.f32 %v994_v5 }
 0x63c   : > { %1351 = vrcp.f32 %v995_v6  ;;  %v1022_v11 = vand.u32 2147483648, %v995_v6  ;;  %v1020_v24 = vand.u32 2147483647, %v995_v6  ;;  %vm1016_vm5 = vweird.f32 %v995_v6 }
 0x63d   : > { %v1008_v25 = vor.u32 1.1754944e-38, %v1007_v20  ;;  %vm1006_vm6 = vcmp.eq.f32.partialorder %v1005_v10, 8.507059e+37 }
 0x63e   : > { %v1023_v30 = vor.u32 1.1754944e-38, %v1022_v11  ;;  %vm1021_vm8 = vcmp.eq.f32.partialorder %v1020_v24, 8.507059e+37 }
 0x641   : > { %v1350_v42 = vpop.eup %1349 }
 0x642   : > { %v1352_v7 = vpop.eup %1351  ;;  %v997_v19 = vmul.f32 %v1350_v42, %v994_v5  ;;  %vm1002_vm1 = vweird.f32 %v1350_v42 }
 0x643   : > { %v1012_v8 = vmul.f32 %v1352_v7, %v995_v6  ;;  %vm1017_vm2 = vweird.f32 %v1352_v7  ;;  %vm1003_vm4 = vmor %vm1001_vm3, %vm1002_vm1 }
 0x644   : > { %v998_v9 = vsub.f32 1.0, %v997_v19  ;;  %vm1018_vm7 = vmor %vm1016_vm5, %vm1017_vm2 }
 0x645   : > { %v1013_v21 = vsub.f32 1.0, %v1012_v8 }
 0x646   : > { %v999_v22 = vmul.f32 %v1350_v42, %v998_v9 }
 0x647   : > { %v1014_v23 = vmul.f32 %v1352_v7, %v1013_v21 }
 0x648   : > { %v1000_v13 = vadd.f32 %v1350_v42, %v999_v22 }
 0x649   : > { %v1015_v26 = vadd.f32 %v1352_v7, %v1014_v23 }
 0x64a   : > { %v1004_v27 = vsel %vm1003_vm4, %v1350_v42, %v1000_v13 }
 0x64b   : > { %v1009_v31 = vsel %vm1006_vm6, %v1008_v25, %v1004_v27  ;;  %v1019_v32 = vsel %vm1018_vm7, %v1352_v7, %v1015_v26 }
 0x64c   : > { %v1024_v33 = vsel %vm1021_vm8, %v1023_v30, %v1019_v32  ;;  %v1026_v34 = vmul.f32 %v1009_v31, %v986_v1 }
 0x64d   : > { %v1027_v35 = vmul.f32 %v1024_v33, %v987_v2 }
 0x64e   : > { %1028 = vst [vmem:[%s422_s12] sm:$0xff] %v1026_v34 }
 0x64f   : > { %1029 = vst [vmem:[%s422_s12 + $0x8] sm:$0xff] %v1027_v35 }
 0x650   : > { %1590 = shalt.err (!%p1587_p9)
}
 0x651   : > { %s1653_s11 = smov 128   ;;  %s1654_s13 = smov 8  }
 0x652   : > { %1246 = dma.vmem_to_hbm [thread:$0]  (%p1806_p4), %s1044_s10, 256, %s1046_s14, %s1031_s22, %s1653_s11, %s1653_s11, %s1654_s13  }
 0x653 PF: > { %s1060_s20 = sand.u32 1, %s1629_s27   ;;  %p2104_p10 = scmp.ge.s32.totalorder %s1641_s30, 2 }
 0x654   : > { %s1061_s21 = scalar_lea.sflag [#allocation4], %s1060_s20 }
 0x655   : > { %p1272_p13 = pnand %p2104_p10, %p1810_p6 }
 0x657   : > { %p1273_p11 = pneg %p1272_p13 }
 0x659   : > { %1624 = dma.done.wait (%p1273_p11), %s1061_s21, 256  }
 0x65a   : > { %1626 = vsyncadd (%p1273_p11), %s1061_s21, 4294967040  ;;  %p24_p0 = scmp.ge.s32.totalorder %s1780_s17, 4   ;;  %s2105_s27 = smov %s1633_s28 }
 0x65b   : > { %s2106_s28 = smov %s1637_s29  ;;  %s2107_s29 = smov %s1791_s18 }
 0x65c   : > { %s2108_s30 = smov %s1780_s17  ;;  %26 = sbr.rel (!%p24_p0) target bundleno = 12 (0xc), region = 121 }
 0x661   :  { %1067 = vsyncpa [#allocation3], 1 }
 0x662   :  { %1069 = vsyncpa [#allocation3 + $0x1], 1 }
 0x663   :  { %1070 = vsyncpa [#allocation6], 1 }
 0x664   :  { %1071 = vsyncpa [#allocation9], 1 }
 0x665   :  { %1072 = vsyncpa [#allocation12], 1 }
 0x666   :  { %1073 = vsyncpa [#allocation4], 1 }
 0x667   :  { %1075 = vsyncpa [#allocation4 + $0x1], 1 }

</bundles_post_ra>
